<compile_context>
chip_gen: v7x
topology: tpu7x:2x2x1
jax: 0.10.0
libtpu: 0.0.40
codegen_flags: <defaults>
</compile_context>

<pallas_src>
import functools

import jax
import jax.numpy as jnp
from jax.experimental import pallas as pl
from jax.experimental.pallas import tpu as pltpu


def _round_up(x, m):
    return ((x + m - 1) // m) * m


def _char_decoder_kernel(ids_ref, gxtab_ref, whh_ref, wout_ref, bout_ref,
                         h0_ref, c0_ref,
                         scores_ref, hT_ref, cT_ref,
                         h_all_sc, *, seq_len):
    """Fused CharDecoder forward in one invocation (no grid).

    ids_ref    : (L*B, 1)   int32 char ids, time-major flattened
    gxtab_ref  : (Vp, 4H)   fused table = emb_table @ W_ih + (b_ih + b_hh),
                            rows zero-padded to Vp (multiple of 128)
    whh_ref    : (H, 4H)    hidden->gates weight
    wout_ref   : (H, Vout)  vocab projection, zero-padded to 128-lane multiple
    bout_ref   : (1, Vout)
    h0/c0      : (B, H)
    scores_ref : (L*B, Vout) lane-dense output (sliced to V in the wrapper)
    hT/cT      : (B, H)
    h_all_sc   : (L*B, H)   VMEM scratch holding every h_t for the epilogue matmul
    """
    B, H = h0_ref.shape
    LB = ids_ref.shape[0]
    Vp = gxtab_ref.shape[0]

    # ---- Prologue: embedding lookup + input projection + bias for ALL timesteps
    # as ONE lane-dense MXU matmul:  one_hot(ids) @ (emb @ W_ih + b).
    ids = ids_ref[...]                                               # (L*B, 1)
    lane = jax.lax.broadcasted_iota(jnp.int32, (LB, Vp), 1)
    one_hot = (lane == ids).astype(jnp.float32)                      # (L*B, Vp)
    gx = jnp.dot(one_hot, gxtab_ref[...],
                 preferred_element_type=jnp.float32)                 # (L*B, 4H)

    w_hh = whh_ref[...]                                              # load once
    h = h0_ref[...]
    c = c0_ref[...]

    # ---- Recurrence: fully unrolled (L small & static); only h @ W_hh per step
    for t in range(seq_len):
        lo, hi = t * B, (t + 1) * B
        gates = gx[lo:hi, :] + jnp.dot(h, w_hh,
                                       preferred_element_type=jnp.float32)  # (B,4H)
        i_g = jax.nn.sigmoid(gates[:, 0 * H:1 * H])
        f_g = jax.nn.sigmoid(gates[:, 1 * H:2 * H])
        g_g = jnp.tanh(gates[:, 2 * H:3 * H])
        o_g = jax.nn.sigmoid(gates[:, 3 * H:4 * H])
        c = f_g * c + i_g * g_g
        h = o_g * jnp.tanh(c)
        h_all_sc[lo:hi, :] = h

    hT_ref[...] = h
    cT_ref[...] = c

    # ---- Epilogue: single batched vocab projection, one lane-dense store ------
    scores_ref[...] = (jnp.dot(h_all_sc[...], wout_ref[...],
                               preferred_element_type=jnp.float32)
                       + bout_ref[...]).astype(scores_ref.dtype)


def char_decoder_forward(input_ids, params, dec_hidden=None):
    """Mirror of CharDecoder.forward.

    input_ids : (L, B) int32 character ids
    params    : dict with emb_table, W_ih, W_hh, b, W_out, b_out
    dec_hidden: optional ((1,B,H), (1,B,H)); zeros if None (PyTorch default)
    returns   : scores (L, B, V), (h_n (1,B,H), c_n (1,B,H))
    """
    L, B = input_ids.shape
    emb_table = params["emb_table"]          # (V, E), pad row zeroed
    W_ih, W_hh, b = params["W_ih"], params["W_hh"], params["b"]
    W_out, b_out = params["W_out"], params["b_out"]
    H = W_hh.shape[0]
    V = W_out.shape[1]
    Vp = _round_up(V, 128)                   # padded one-hot / fused-table rows
    Vout = _round_up(V, 128)                 # lane-dense padded scores width

    # Fold Embedding -> W_ih -> bias into one lookup table.  Under jit with
    # closed-over params this is a tiny (V,E)@(E,4H) op XLA can hoist/CSE.
    gx_table = emb_table @ W_ih + b                                  # (V, 4H)
    gx_table_p = jnp.zeros((Vp, 4 * H), jnp.float32).at[:V].set(gx_table)

    # Zero-pad the output projection so the kernel's scores store is a single
    # unmasked, lane-dense block; padded columns are sliced off below.
    W_out_p = jnp.zeros((H, Vout), jnp.float32).at[:, :V].set(W_out)
    b_out_p = jnp.zeros((1, Vout), jnp.float32).at[:, :V].set(b_out)

    if dec_hidden is None:
        h0 = jnp.zeros((B, H), jnp.float32)
        c0 = jnp.zeros((B, H), jnp.float32)
    else:
        h0 = dec_hidden[0].reshape(B, H)
        c0 = dec_hidden[1].reshape(B, H)

    ids = input_ids.reshape(L * B, 1).astype(jnp.int32)

    kernel = functools.partial(_char_decoder_kernel, seq_len=L)

    # Single invocation, no grid: all operands fit comfortably in VMEM at these
    # shapes; weights are loaded exactly once, h/c live in registers.
    scores_p, hT, cT = pl.pallas_call(
        kernel,
        out_shape=(
            jax.ShapeDtypeStruct((L * B, Vout), jnp.float32),
            jax.ShapeDtypeStruct((B, H), jnp.float32),
            jax.ShapeDtypeStruct((B, H), jnp.float32),
        ),
        scratch_shapes=[pltpu.VMEM((L * B, H), jnp.float32)],
    )(ids, gx_table_p, W_hh, W_out_p, b_out_p, h0, c0)

    scores = scores_p[:, :V].reshape(L, B, V)
    return scores, (hT.reshape(1, B, H), cT.reshape(1, B, H))


def _reference_forward(input_ids, params, dec_hidden=None):
    """Pure-JAX reference (same math) for a correctness check."""
    emb_table = params["emb_table"]
    W_ih, W_hh, b = params["W_ih"], params["W_hh"], params["b"]
    W_out, b_out = params["W_out"], params["b_out"]
    L, B = input_ids.shape
    H = W_hh.shape[0]
    emb = jnp.take(emb_table, input_ids, axis=0)
    if dec_hidden is None:
        h = jnp.zeros((B, H), jnp.float32)
        c = jnp.zeros((B, H), jnp.float32)
    else:
        h = dec_hidden[0].reshape(B, H)
        c = dec_hidden[1].reshape(B, H)

    def step(carry, x_t):
        h, c = carry
        g = x_t @ W_ih + h @ W_hh + b[0]
        i = jax.nn.sigmoid(g[:, 0 * H:1 * H])
        f = jax.nn.sigmoid(g[:, 1 * H:2 * H])
        gg = jnp.tanh(g[:, 2 * H:3 * H])
        o = jax.nn.sigmoid(g[:, 3 * H:4 * H])
        c = f * c + i * gg
        h = o * jnp.tanh(c)
        return (h, c), h @ W_out + b_out[0]

    (h, c), scores = jax.lax.scan(step, (h, c), emb)
    return scores, (h.reshape(1, B, H), c.reshape(1, B, H))


def make_params(key, vocab_size, char_embedding_size, hidden_size, char_pad=0):
    """Deterministic synthetic parameters (shapes match the nn.Module __init__)."""
    ks = jax.random.split(key, 6)
    E, H, V = char_embedding_size, hidden_size, vocab_size
    emb = 0.1 * jax.random.normal(ks[0], (V, E), jnp.float32)
    emb = emb.at[char_pad].set(0.0)                    # padding_idx row = 0
    params = {
        "emb_table": emb,
        "W_ih": 0.1 * jax.random.normal(ks[1], (E, 4 * H), jnp.float32),
        "W_hh": 0.1 * jax.random.normal(ks[2], (H, 4 * H), jnp.float32),
        # combined b_ih + b_hh (kept 2-D for TPU-friendly layout)
        "b": 0.1 * jax.random.normal(ks[3], (1, 4 * H), jnp.float32),
        "W_out": 0.1 * jax.random.normal(ks[4], (H, V), jnp.float32),
        "b_out": 0.1 * jax.random.normal(ks[5], (1, V), jnp.float32),
    }
    return params


if __name__ == "__main__":
    # Small shapes consistent with the module's forward():
    L, B = 8, 4                 # (length, batch_size)
    H = 32                      # hidden_size
    E = 16                      # char_embedding_size
    V = 30                      # len(target_vocab.char2id)
    CHAR_PAD = 0

    key = jax.random.PRNGKey(0)
    k_par, k_ids, k_h, k_c = jax.random.split(key, 4)

    params = make_params(k_par, V, E, H, char_pad=CHAR_PAD)
    input_ids = jax.random.randint(k_ids, (L, B), 0, V, dtype=jnp.int32)
    dec_hidden0 = (0.1 * jax.random.normal(k_h, (1, B, H), jnp.float32),
                   0.1 * jax.random.normal(k_c, (1, B, H), jnp.float32))

    fwd = jax.jit(functools.partial(char_decoder_forward, params=params))
    scores, (h_n, c_n) = fwd(input_ids, dec_hidden=dec_hidden0)
    jax.block_until_ready((scores, h_n, c_n))

    # Correctness check against pure-JAX reference.
    ref_scores, (ref_h, ref_c) = _reference_forward(input_ids, params, dec_hidden0)
    assert scores.shape == (L, B, V)
    assert h_n.shape == (1, B, H) and c_n.shape == (1, B, H)
    assert jnp.allclose(scores, ref_scores, atol=2e-5, rtol=2e-5)
    assert jnp.allclose(h_n, ref_h, atol=2e-5, rtol=2e-5)
    assert jnp.allclose(c_n, ref_c, atol=2e-5, rtol=2e-5)

    # Also check the dec_hidden=None default path (PyTorch zero-state default).
    s2, (h2, c2) = jax.jit(functools.partial(char_decoder_forward, params=params))(input_ids)
    r2, (rh2, rc2) = _reference_forward(input_ids, params, None)
    assert jnp.allclose(s2, r2, atol=2e-5, rtol=2e-5)
    assert jnp.allclose(h2, rh2, atol=2e-5, rtol=2e-5)
    assert jnp.allclose(c2, rc2, atol=2e-5, rtol=2e-5)

    print("KERNEL_OK")
</pallas_src>

<mosaic_0001>
module attributes {stable_mosaic.version = 11 : i64} {
  func.func @_char_decoder_kernel(%arg0: memref<32x1xi32, #tpu.memory_space<vmem>>, %arg1: memref<128x128xf32, #tpu.memory_space<vmem>>, %arg2: memref<32x128xf32, #tpu.memory_space<vmem>>, %arg3: memref<32x128xf32, #tpu.memory_space<vmem>>, %arg4: memref<1x128xf32, #tpu.memory_space<vmem>>, %arg5: memref<4x32xf32, #tpu.memory_space<vmem>>, %arg6: memref<4x32xf32, #tpu.memory_space<vmem>>, %arg7: memref<32x128xf32, #tpu.memory_space<vmem>>, %arg8: memref<4x32xf32, #tpu.memory_space<vmem>>, %arg9: memref<4x32xf32, #tpu.memory_space<vmem>>, %arg10: memref<32x32xf32, #tpu.memory_space<vmem>>) attributes {dimension_semantics = [], scalar_prefetch = 0 : i64, scratch_operands = 1 : i64, tpu.core_type = #tpu.core_type<tc>} {
    %c0 = arith.constant 0 : index
    %c0_0 = arith.constant 0 : index
    %0 = vector.load %arg0[%c0, %c0_0] : memref<32x1xi32, #tpu.memory_space<vmem>>, vector<32x1xi32>
    %1 = tpu.iota {dimensions = array<i32: 1>} : vector<32x128xi32>
    %2 = vector.broadcast %0 : vector<32x1xi32> to vector<32x128xi32>
    %3 = arith.cmpi eq, %1, %2 : vector<32x128xi32>
    %4 = arith.extui %3 : vector<32x128xi1> to vector<32x128xi32>
    %5 = arith.sitofp %4 : vector<32x128xi32> to vector<32x128xf32>
    %c0_1 = arith.constant 0 : index
    %c0_2 = arith.constant 0 : index
    %6 = vector.load %arg1[%c0_1, %c0_2] : memref<128x128xf32, #tpu.memory_space<vmem>>, vector<128x128xf32>
    %cst = arith.constant dense<0.000000e+00> : vector<32x128xf32>
    %7 = tpu.matmul %5, %6, %cst {dimension_numbers = #tpu.dot_dimension_numbers<[1], [0], [0], [1], [0, 0, 1, 1], [], []>} : vector<32x128xf32>, vector<128x128xf32>, vector<32x128xf32> -> vector<32x128xf32>
    %c0_3 = arith.constant 0 : index
    %c0_4 = arith.constant 0 : index
    %8 = vector.load %arg2[%c0_3, %c0_4] : memref<32x128xf32, #tpu.memory_space<vmem>>, vector<32x128xf32>
    %c0_5 = arith.constant 0 : index
    %c0_6 = arith.constant 0 : index
    %9 = vector.load %arg5[%c0_5, %c0_6] : memref<4x32xf32, #tpu.memory_space<vmem>>, vector<4x32xf32>
    %c0_7 = arith.constant 0 : index
    %c0_8 = arith.constant 0 : index
    %10 = vector.load %arg6[%c0_7, %c0_8] : memref<4x32xf32, #tpu.memory_space<vmem>>, vector<4x32xf32>
    %11 = vector.extract_strided_slice %7 {offsets = [0, 0], sizes = [4, 128], strides = [1, 1]} : vector<32x128xf32> to vector<4x128xf32>
    %cst_9 = arith.constant dense<0.000000e+00> : vector<4x128xf32>
    %12 = tpu.matmul %9, %8, %cst_9 {dimension_numbers = #tpu.dot_dimension_numbers<[1], [0], [0], [1], [0, 0, 1, 1], [], []>} : vector<4x32xf32>, vector<32x128xf32>, vector<4x128xf32> -> vector<4x128xf32>
    %13 = arith.addf %11, %12 : vector<4x128xf32>
    %14 = vector.extract_strided_slice %13 {offsets = [0, 0], sizes = [4, 32], strides = [1, 1]} : vector<4x128xf32> to vector<4x32xf32>
    %15 = arith.negf %14 : vector<4x32xf32>
    %16 = math.exp %15 : vector<4x32xf32>
    %cst_10 = arith.constant 1.000000e+00 : f32
    %17 = vector.broadcast %cst_10 : f32 to vector<4x32xf32>
    %18 = arith.addf %17, %16 : vector<4x32xf32>
    %19 = arith.divf %17, %18 : vector<4x32xf32>
    %20 = vector.extract_strided_slice %13 {offsets = [0, 32], sizes = [4, 32], strides = [1, 1]} : vector<4x128xf32> to vector<4x32xf32>
    %21 = arith.negf %20 : vector<4x32xf32>
    %22 = math.exp %21 : vector<4x32xf32>
    %cst_11 = arith.constant 1.000000e+00 : f32
    %23 = vector.broadcast %cst_11 : f32 to vector<4x32xf32>
    %24 = arith.addf %23, %22 : vector<4x32xf32>
    %25 = arith.divf %23, %24 : vector<4x32xf32>
    %26 = vector.extract_strided_slice %13 {offsets = [0, 64], sizes = [4, 32], strides = [1, 1]} : vector<4x128xf32> to vector<4x32xf32>
    %27 = math.tanh %26 : vector<4x32xf32>
    %28 = vector.extract_strided_slice %13 {offsets = [0, 96], sizes = [4, 32], strides = [1, 1]} : vector<4x128xf32> to vector<4x32xf32>
    %29 = arith.negf %28 : vector<4x32xf32>
    %30 = math.exp %29 : vector<4x32xf32>
    %cst_12 = arith.constant 1.000000e+00 : f32
    %31 = vector.broadcast %cst_12 : f32 to vector<4x32xf32>
    %32 = arith.addf %31, %30 : vector<4x32xf32>
    %33 = arith.divf %31, %32 : vector<4x32xf32>
    %34 = arith.mulf %25, %10 : vector<4x32xf32>
    %35 = arith.mulf %19, %27 : vector<4x32xf32>
    %36 = arith.addf %34, %35 : vector<4x32xf32>
    %37 = math.tanh %36 : vector<4x32xf32>
    %38 = arith.mulf %33, %37 : vector<4x32xf32>
    %c0_13 = arith.constant 0 : index
    %c0_14 = arith.constant 0 : index
    %39 = vector.load %arg10[%c0_13, %c0_14] : memref<32x32xf32, #tpu.memory_space<vmem>>, vector<4x32xf32>
    tpu.vector_store %arg10[%c0_13, %c0_14], %38 {strides = array<i32>} : memref<32x32xf32, #tpu.memory_space<vmem>>, vector<4x32xf32>,
    %40 = vector.extract_strided_slice %7 {offsets = [4, 0], sizes = [4, 128], strides = [1, 1]} : vector<32x128xf32> to vector<4x128xf32>
    %cst_15 = arith.constant dense<0.000000e+00> : vector<4x128xf32>
    %41 = tpu.matmul %38, %8, %cst_15 {dimension_numbers = #tpu.dot_dimension_numbers<[1], [0], [0], [1], [0, 0, 1, 1], [], []>} : vector<4x32xf32>, vector<32x128xf32>, vector<4x128xf32> -> vector<4x128xf32>
    %42 = arith.addf %40, %41 : vector<4x128xf32>
    %43 = vector.extract_strided_slice %42 {offsets = [0, 0], sizes = [4, 32], strides = [1, 1]} : vector<4x128xf32> to vector<4x32xf32>
    %44 = arith.negf %43 : vector<4x32xf32>
    %45 = math.exp %44 : vector<4x32xf32>
    %cst_16 = arith.constant 1.000000e+00 : f32
    %46 = vector.broadcast %cst_16 : f32 to vector<4x32xf32>
    %47 = arith.addf %46, %45 : vector<4x32xf32>
    %48 = arith.divf %46, %47 : vector<4x32xf32>
    %49 = vector.extract_strided_slice %42 {offsets = [0, 32], sizes = [4, 32], strides = [1, 1]} : vector<4x128xf32> to vector<4x32xf32>
    %50 = arith.negf %49 : vector<4x32xf32>
    %51 = math.exp %50 : vector<4x32xf32>
    %cst_17 = arith.constant 1.000000e+00 : f32
    %52 = vector.broadcast %cst_17 : f32 to vector<4x32xf32>
    %53 = arith.addf %52, %51 : vector<4x32xf32>
    %54 = arith.divf %52, %53 : vector<4x32xf32>
    %55 = vector.extract_strided_slice %42 {offsets = [0, 64], sizes = [4, 32], strides = [1, 1]} : vector<4x128xf32> to vector<4x32xf32>
    %56 = math.tanh %55 : vector<4x32xf32>
    %57 = vector.extract_strided_slice %42 {offsets = [0, 96], sizes = [4, 32], strides = [1, 1]} : vector<4x128xf32> to vector<4x32xf32>
    %58 = arith.negf %57 : vector<4x32xf32>
    %59 = math.exp %58 : vector<4x32xf32>
    %cst_18 = arith.constant 1.000000e+00 : f32
    %60 = vector.broadcast %cst_18 : f32 to vector<4x32xf32>
    %61 = arith.addf %60, %59 : vector<4x32xf32>
    %62 = arith.divf %60, %61 : vector<4x32xf32>
    %63 = arith.mulf %54, %36 : vector<4x32xf32>
    %64 = arith.mulf %48, %56 : vector<4x32xf32>
    %65 = arith.addf %63, %64 : vector<4x32xf32>
    %66 = math.tanh %65 : vector<4x32xf32>
    %67 = arith.mulf %62, %66 : vector<4x32xf32>
    %c4 = arith.constant 4 : index
    %c0_19 = arith.constant 0 : index
    %68 = vector.load %arg10[%c4, %c0_19] : memref<32x32xf32, #tpu.memory_space<vmem>>, vector<4x32xf32>
    tpu.vector_store %arg10[%c4, %c0_19], %67 {strides = array<i32>} : memref<32x32xf32, #tpu.memory_space<vmem>>, vector<4x32xf32>,
    %69 = vector.extract_strided_slice %7 {offsets = [8, 0], sizes = [4, 128], strides = [1, 1]} : vector<32x128xf32> to vector<4x128xf32>
    %cst_20 = arith.constant dense<0.000000e+00> : vector<4x128xf32>
    %70 = tpu.matmul %67, %8, %cst_20 {dimension_numbers = #tpu.dot_dimension_numbers<[1], [0], [0], [1], [0, 0, 1, 1], [], []>} : vector<4x32xf32>, vector<32x128xf32>, vector<4x128xf32> -> vector<4x128xf32>
    %71 = arith.addf %69, %70 : vector<4x128xf32>
    %72 = vector.extract_strided_slice %71 {offsets = [0, 0], sizes = [4, 32], strides = [1, 1]} : vector<4x128xf32> to vector<4x32xf32>
    %73 = arith.negf %72 : vector<4x32xf32>
    %74 = math.exp %73 : vector<4x32xf32>
    %cst_21 = arith.constant 1.000000e+00 : f32
    %75 = vector.broadcast %cst_21 : f32 to vector<4x32xf32>
    %76 = arith.addf %75, %74 : vector<4x32xf32>
    %77 = arith.divf %75, %76 : vector<4x32xf32>
    %78 = vector.extract_strided_slice %71 {offsets = [0, 32], sizes = [4, 32], strides = [1, 1]} : vector<4x128xf32> to vector<4x32xf32>
    %79 = arith.negf %78 : vector<4x32xf32>
    %80 = math.exp %79 : vector<4x32xf32>
    %cst_22 = arith.constant 1.000000e+00 : f32
    %81 = vector.broadcast %cst_22 : f32 to vector<4x32xf32>
    %82 = arith.addf %81, %80 : vector<4x32xf32>
    %83 = arith.divf %81, %82 : vector<4x32xf32>
    %84 = vector.extract_strided_slice %71 {offsets = [0, 64], sizes = [4, 32], strides = [1, 1]} : vector<4x128xf32> to vector<4x32xf32>
    %85 = math.tanh %84 : vector<4x32xf32>
    %86 = vector.extract_strided_slice %71 {offsets = [0, 96], sizes = [4, 32], strides = [1, 1]} : vector<4x128xf32> to vector<4x32xf32>
    %87 = arith.negf %86 : vector<4x32xf32>
    %88 = math.exp %87 : vector<4x32xf32>
    %cst_23 = arith.constant 1.000000e+00 : f32
    %89 = vector.broadcast %cst_23 : f32 to vector<4x32xf32>
    %90 = arith.addf %89, %88 : vector<4x32xf32>
    %91 = arith.divf %89, %90 : vector<4x32xf32>
    %92 = arith.mulf %83, %65 : vector<4x32xf32>
    %93 = arith.mulf %77, %85 : vector<4x32xf32>
    %94 = arith.addf %92, %93 : vector<4x32xf32>
    %95 = math.tanh %94 : vector<4x32xf32>
    %96 = arith.mulf %91, %95 : vector<4x32xf32>
    %c8 = arith.constant 8 : index
    %c0_24 = arith.constant 0 : index
    %97 = vector.load %arg10[%c8, %c0_24] : memref<32x32xf32, #tpu.memory_space<vmem>>, vector<4x32xf32>
    tpu.vector_store %arg10[%c8, %c0_24], %96 {strides = array<i32>} : memref<32x32xf32, #tpu.memory_space<vmem>>, vector<4x32xf32>,
    %98 = vector.extract_strided_slice %7 {offsets = [12, 0], sizes = [4, 128], strides = [1, 1]} : vector<32x128xf32> to vector<4x128xf32>
    %cst_25 = arith.constant dense<0.000000e+00> : vector<4x128xf32>
    %99 = tpu.matmul %96, %8, %cst_25 {dimension_numbers = #tpu.dot_dimension_numbers<[1], [0], [0], [1], [0, 0, 1, 1], [], []>} : vector<4x32xf32>, vector<32x128xf32>, vector<4x128xf32> -> vector<4x128xf32>
    %100 = arith.addf %98, %99 : vector<4x128xf32>
    %101 = vector.extract_strided_slice %100 {offsets = [0, 0], sizes = [4, 32], strides = [1, 1]} : vector<4x128xf32> to vector<4x32xf32>
    %102 = arith.negf %101 : vector<4x32xf32>
    %103 = math.exp %102 : vector<4x32xf32>
    %cst_26 = arith.constant 1.000000e+00 : f32
    %104 = vector.broadcast %cst_26 : f32 to vector<4x32xf32>
    %105 = arith.addf %104, %103 : vector<4x32xf32>
    %106 = arith.divf %104, %105 : vector<4x32xf32>
    %107 = vector.extract_strided_slice %100 {offsets = [0, 32], sizes = [4, 32], strides = [1, 1]} : vector<4x128xf32> to vector<4x32xf32>
    %108 = arith.negf %107 : vector<4x32xf32>
    %109 = math.exp %108 : vector<4x32xf32>
    %cst_27 = arith.constant 1.000000e+00 : f32
    %110 = vector.broadcast %cst_27 : f32 to vector<4x32xf32>
    %111 = arith.addf %110, %109 : vector<4x32xf32>
    %112 = arith.divf %110, %111 : vector<4x32xf32>
    %113 = vector.extract_strided_slice %100 {offsets = [0, 64], sizes = [4, 32], strides = [1, 1]} : vector<4x128xf32> to vector<4x32xf32>
    %114 = math.tanh %113 : vector<4x32xf32>
    %115 = vector.extract_strided_slice %100 {offsets = [0, 96], sizes = [4, 32], strides = [1, 1]} : vector<4x128xf32> to vector<4x32xf32>
    %116 = arith.negf %115 : vector<4x32xf32>
    %117 = math.exp %116 : vector<4x32xf32>
    %cst_28 = arith.constant 1.000000e+00 : f32
    %118 = vector.broadcast %cst_28 : f32 to vector<4x32xf32>
    %119 = arith.addf %118, %117 : vector<4x32xf32>
    %120 = arith.divf %118, %119 : vector<4x32xf32>
    %121 = arith.mulf %112, %94 : vector<4x32xf32>
    %122 = arith.mulf %106, %114 : vector<4x32xf32>
    %123 = arith.addf %121, %122 : vector<4x32xf32>
    %124 = math.tanh %123 : vector<4x32xf32>
    %125 = arith.mulf %120, %124 : vector<4x32xf32>
    %c12 = arith.constant 12 : index
    %c0_29 = arith.constant 0 : index
    %126 = vector.load %arg10[%c12, %c0_29] : memref<32x32xf32, #tpu.memory_space<vmem>>, vector<4x32xf32>
    tpu.vector_store %arg10[%c12, %c0_29], %125 {strides = array<i32>} : memref<32x32xf32, #tpu.memory_space<vmem>>, vector<4x32xf32>,
    %127 = vector.extract_strided_slice %7 {offsets = [16, 0], sizes = [4, 128], strides = [1, 1]} : vector<32x128xf32> to vector<4x128xf32>
    %cst_30 = arith.constant dense<0.000000e+00> : vector<4x128xf32>
    %128 = tpu.matmul %125, %8, %cst_30 {dimension_numbers = #tpu.dot_dimension_numbers<[1], [0], [0], [1], [0, 0, 1, 1], [], []>} : vector<4x32xf32>, vector<32x128xf32>, vector<4x128xf32> -> vector<4x128xf32>
    %129 = arith.addf %127, %128 : vector<4x128xf32>
    %130 = vector.extract_strided_slice %129 {offsets = [0, 0], sizes = [4, 32], strides = [1, 1]} : vector<4x128xf32> to vector<4x32xf32>
    %131 = arith.negf %130 : vector<4x32xf32>
    %132 = math.exp %131 : vector<4x32xf32>
    %cst_31 = arith.constant 1.000000e+00 : f32
    %133 = vector.broadcast %cst_31 : f32 to vector<4x32xf32>
    %134 = arith.addf %133, %132 : vector<4x32xf32>
    %135 = arith.divf %133, %134 : vector<4x32xf32>
    %136 = vector.extract_strided_slice %129 {offsets = [0, 32], sizes = [4, 32], strides = [1, 1]} : vector<4x128xf32> to vector<4x32xf32>
    %137 = arith.negf %136 : vector<4x32xf32>
    %138 = math.exp %137 : vector<4x32xf32>
    %cst_32 = arith.constant 1.000000e+00 : f32
    %139 = vector.broadcast %cst_32 : f32 to vector<4x32xf32>
    %140 = arith.addf %139, %138 : vector<4x32xf32>
    %141 = arith.divf %139, %140 : vector<4x32xf32>
    %142 = vector.extract_strided_slice %129 {offsets = [0, 64], sizes = [4, 32], strides = [1, 1]} : vector<4x128xf32> to vector<4x32xf32>
    %143 = math.tanh %142 : vector<4x32xf32>
    %144 = vector.extract_strided_slice %129 {offsets = [0, 96], sizes = [4, 32], strides = [1, 1]} : vector<4x128xf32> to vector<4x32xf32>
    %145 = arith.negf %144 : vector<4x32xf32>
    %146 = math.exp %145 : vector<4x32xf32>
    %cst_33 = arith.constant 1.000000e+00 : f32
    %147 = vector.broadcast %cst_33 : f32 to vector<4x32xf32>
    %148 = arith.addf %147, %146 : vector<4x32xf32>
    %149 = arith.divf %147, %148 : vector<4x32xf32>
    %150 = arith.mulf %141, %123 : vector<4x32xf32>
    %151 = arith.mulf %135, %143 : vector<4x32xf32>
    %152 = arith.addf %150, %151 : vector<4x32xf32>
    %153 = math.tanh %152 : vector<4x32xf32>
    %154 = arith.mulf %149, %153 : vector<4x32xf32>
    %c16 = arith.constant 16 : index
    %c0_34 = arith.constant 0 : index
    %155 = vector.load %arg10[%c16, %c0_34] : memref<32x32xf32, #tpu.memory_space<vmem>>, vector<4x32xf32>
    tpu.vector_store %arg10[%c16, %c0_34], %154 {strides = array<i32>} : memref<32x32xf32, #tpu.memory_space<vmem>>, vector<4x32xf32>,
    %156 = vector.extract_strided_slice %7 {offsets = [20, 0], sizes = [4, 128], strides = [1, 1]} : vector<32x128xf32> to vector<4x128xf32>
    %cst_35 = arith.constant dense<0.000000e+00> : vector<4x128xf32>
    %157 = tpu.matmul %154, %8, %cst_35 {dimension_numbers = #tpu.dot_dimension_numbers<[1], [0], [0], [1], [0, 0, 1, 1], [], []>} : vector<4x32xf32>, vector<32x128xf32>, vector<4x128xf32> -> vector<4x128xf32>
    %158 = arith.addf %156, %157 : vector<4x128xf32>
    %159 = vector.extract_strided_slice %158 {offsets = [0, 0], sizes = [4, 32], strides = [1, 1]} : vector<4x128xf32> to vector<4x32xf32>
    %160 = arith.negf %159 : vector<4x32xf32>
    %161 = math.exp %160 : vector<4x32xf32>
    %cst_36 = arith.constant 1.000000e+00 : f32
    %162 = vector.broadcast %cst_36 : f32 to vector<4x32xf32>
    %163 = arith.addf %162, %161 : vector<4x32xf32>
    %164 = arith.divf %162, %163 : vector<4x32xf32>
    %165 = vector.extract_strided_slice %158 {offsets = [0, 32], sizes = [4, 32], strides = [1, 1]} : vector<4x128xf32> to vector<4x32xf32>
    %166 = arith.negf %165 : vector<4x32xf32>
    %167 = math.exp %166 : vector<4x32xf32>
    %cst_37 = arith.constant 1.000000e+00 : f32
    %168 = vector.broadcast %cst_37 : f32 to vector<4x32xf32>
    %169 = arith.addf %168, %167 : vector<4x32xf32>
    %170 = arith.divf %168, %169 : vector<4x32xf32>
    %171 = vector.extract_strided_slice %158 {offsets = [0, 64], sizes = [4, 32], strides = [1, 1]} : vector<4x128xf32> to vector<4x32xf32>
    %172 = math.tanh %171 : vector<4x32xf32>
    %173 = vector.extract_strided_slice %158 {offsets = [0, 96], sizes = [4, 32], strides = [1, 1]} : vector<4x128xf32> to vector<4x32xf32>
    %174 = arith.negf %173 : vector<4x32xf32>
    %175 = math.exp %174 : vector<4x32xf32>
    %cst_38 = arith.constant 1.000000e+00 : f32
    %176 = vector.broadcast %cst_38 : f32 to vector<4x32xf32>
    %177 = arith.addf %176, %175 : vector<4x32xf32>
    %178 = arith.divf %176, %177 : vector<4x32xf32>
    %179 = arith.mulf %170, %152 : vector<4x32xf32>
    %180 = arith.mulf %164, %172 : vector<4x32xf32>
    %181 = arith.addf %179, %180 : vector<4x32xf32>
    %182 = math.tanh %181 : vector<4x32xf32>
    %183 = arith.mulf %178, %182 : vector<4x32xf32>
    %c20 = arith.constant 20 : index
    %c0_39 = arith.constant 0 : index
    %184 = vector.load %arg10[%c20, %c0_39] : memref<32x32xf32, #tpu.memory_space<vmem>>, vector<4x32xf32>
    tpu.vector_store %arg10[%c20, %c0_39], %183 {strides = array<i32>} : memref<32x32xf32, #tpu.memory_space<vmem>>, vector<4x32xf32>,
    %185 = vector.extract_strided_slice %7 {offsets = [24, 0], sizes = [4, 128], strides = [1, 1]} : vector<32x128xf32> to vector<4x128xf32>
    %cst_40 = arith.constant dense<0.000000e+00> : vector<4x128xf32>
    %186 = tpu.matmul %183, %8, %cst_40 {dimension_numbers = #tpu.dot_dimension_numbers<[1], [0], [0], [1], [0, 0, 1, 1], [], []>} : vector<4x32xf32>, vector<32x128xf32>, vector<4x128xf32> -> vector<4x128xf32>
    %187 = arith.addf %185, %186 : vector<4x128xf32>
    %188 = vector.extract_strided_slice %187 {offsets = [0, 0], sizes = [4, 32], strides = [1, 1]} : vector<4x128xf32> to vector<4x32xf32>
    %189 = arith.negf %188 : vector<4x32xf32>
    %190 = math.exp %189 : vector<4x32xf32>
    %cst_41 = arith.constant 1.000000e+00 : f32
    %191 = vector.broadcast %cst_41 : f32 to vector<4x32xf32>
    %192 = arith.addf %191, %190 : vector<4x32xf32>
    %193 = arith.divf %191, %192 : vector<4x32xf32>
    %194 = vector.extract_strided_slice %187 {offsets = [0, 32], sizes = [4, 32], strides = [1, 1]} : vector<4x128xf32> to vector<4x32xf32>
    %195 = arith.negf %194 : vector<4x32xf32>
    %196 = math.exp %195 : vector<4x32xf32>
    %cst_42 = arith.constant 1.000000e+00 : f32
    %197 = vector.broadcast %cst_42 : f32 to vector<4x32xf32>
    %198 = arith.addf %197, %196 : vector<4x32xf32>
    %199 = arith.divf %197, %198 : vector<4x32xf32>
    %200 = vector.extract_strided_slice %187 {offsets = [0, 64], sizes = [4, 32], strides = [1, 1]} : vector<4x128xf32> to vector<4x32xf32>
    %201 = math.tanh %200 : vector<4x32xf32>
    %202 = vector.extract_strided_slice %187 {offsets = [0, 96], sizes = [4, 32], strides = [1, 1]} : vector<4x128xf32> to vector<4x32xf32>
    %203 = arith.negf %202 : vector<4x32xf32>
    %204 = math.exp %203 : vector<4x32xf32>
    %cst_43 = arith.constant 1.000000e+00 : f32
    %205 = vector.broadcast %cst_43 : f32 to vector<4x32xf32>
    %206 = arith.addf %205, %204 : vector<4x32xf32>
    %207 = arith.divf %205, %206 : vector<4x32xf32>
    %208 = arith.mulf %199, %181 : vector<4x32xf32>
    %209 = arith.mulf %193, %201 : vector<4x32xf32>
    %210 = arith.addf %208, %209 : vector<4x32xf32>
    %211 = math.tanh %210 : vector<4x32xf32>
    %212 = arith.mulf %207, %211 : vector<4x32xf32>
    %c24 = arith.constant 24 : index
    %c0_44 = arith.constant 0 : index
    %213 = vector.load %arg10[%c24, %c0_44] : memref<32x32xf32, #tpu.memory_space<vmem>>, vector<4x32xf32>
    tpu.vector_store %arg10[%c24, %c0_44], %212 {strides = array<i32>} : memref<32x32xf32, #tpu.memory_space<vmem>>, vector<4x32xf32>,
    %214 = vector.extract_strided_slice %7 {offsets = [28, 0], sizes = [4, 128], strides = [1, 1]} : vector<32x128xf32> to vector<4x128xf32>
    %cst_45 = arith.constant dense<0.000000e+00> : vector<4x128xf32>
    %215 = tpu.matmul %212, %8, %cst_45 {dimension_numbers = #tpu.dot_dimension_numbers<[1], [0], [0], [1], [0, 0, 1, 1], [], []>} : vector<4x32xf32>, vector<32x128xf32>, vector<4x128xf32> -> vector<4x128xf32>
    %216 = arith.addf %214, %215 : vector<4x128xf32>
    %217 = vector.extract_strided_slice %216 {offsets = [0, 0], sizes = [4, 32], strides = [1, 1]} : vector<4x128xf32> to vector<4x32xf32>
    %218 = arith.negf %217 : vector<4x32xf32>
    %219 = math.exp %218 : vector<4x32xf32>
    %cst_46 = arith.constant 1.000000e+00 : f32
    %220 = vector.broadcast %cst_46 : f32 to vector<4x32xf32>
    %221 = arith.addf %220, %219 : vector<4x32xf32>
    %222 = arith.divf %220, %221 : vector<4x32xf32>
    %223 = vector.extract_strided_slice %216 {offsets = [0, 32], sizes = [4, 32], strides = [1, 1]} : vector<4x128xf32> to vector<4x32xf32>
    %224 = arith.negf %223 : vector<4x32xf32>
    %225 = math.exp %224 : vector<4x32xf32>
    %cst_47 = arith.constant 1.000000e+00 : f32
    %226 = vector.broadcast %cst_47 : f32 to vector<4x32xf32>
    %227 = arith.addf %226, %225 : vector<4x32xf32>
    %228 = arith.divf %226, %227 : vector<4x32xf32>
    %229 = vector.extract_strided_slice %216 {offsets = [0, 64], sizes = [4, 32], strides = [1, 1]} : vector<4x128xf32> to vector<4x32xf32>
    %230 = math.tanh %229 : vector<4x32xf32>
    %231 = vector.extract_strided_slice %216 {offsets = [0, 96], sizes = [4, 32], strides = [1, 1]} : vector<4x128xf32> to vector<4x32xf32>
    %232 = arith.negf %231 : vector<4x32xf32>
    %233 = math.exp %232 : vector<4x32xf32>
    %cst_48 = arith.constant 1.000000e+00 : f32
    %234 = vector.broadcast %cst_48 : f32 to vector<4x32xf32>
    %235 = arith.addf %234, %233 : vector<4x32xf32>
    %236 = arith.divf %234, %235 : vector<4x32xf32>
    %237 = arith.mulf %228, %210 : vector<4x32xf32>
    %238 = arith.mulf %222, %230 : vector<4x32xf32>
    %239 = arith.addf %237, %238 : vector<4x32xf32>
    %240 = math.tanh %239 : vector<4x32xf32>
    %241 = arith.mulf %236, %240 : vector<4x32xf32>
    %c28 = arith.constant 28 : index
    %c0_49 = arith.constant 0 : index
    %242 = vector.load %arg10[%c28, %c0_49] : memref<32x32xf32, #tpu.memory_space<vmem>>, vector<4x32xf32>
    tpu.vector_store %arg10[%c28, %c0_49], %241 {strides = array<i32>} : memref<32x32xf32, #tpu.memory_space<vmem>>, vector<4x32xf32>,
    %c0_50 = arith.constant 0 : index
    %c0_51 = arith.constant 0 : index
    %243 = vector.load %arg8[%c0_50, %c0_51] : memref<4x32xf32, #tpu.memory_space<vmem>>, vector<4x32xf32>
    tpu.vector_store %arg8[%c0_50, %c0_51], %241 {strides = array<i32>} : memref<4x32xf32, #tpu.memory_space<vmem>>, vector<4x32xf32>,
    %c0_52 = arith.constant 0 : index
    %c0_53 = arith.constant 0 : index
    %244 = vector.load %arg9[%c0_52, %c0_53] : memref<4x32xf32, #tpu.memory_space<vmem>>, vector<4x32xf32>
    tpu.vector_store %arg9[%c0_52, %c0_53], %239 {strides = array<i32>} : memref<4x32xf32, #tpu.memory_space<vmem>>, vector<4x32xf32>,
    %c0_54 = arith.constant 0 : index
    %c0_55 = arith.constant 0 : index
    %245 = vector.load %arg10[%c0_54, %c0_55] : memref<32x32xf32, #tpu.memory_space<vmem>>, vector<32x32xf32>
    %c0_56 = arith.constant 0 : index
    %c0_57 = arith.constant 0 : index
    %246 = vector.load %arg3[%c0_56, %c0_57] : memref<32x128xf32, #tpu.memory_space<vmem>>, vector<32x128xf32>
    %cst_58 = arith.constant dense<0.000000e+00> : vector<32x128xf32>
    %247 = tpu.matmul %245, %246, %cst_58 {dimension_numbers = #tpu.dot_dimension_numbers<[1], [0], [0], [1], [0, 0, 1, 1], [], []>} : vector<32x32xf32>, vector<32x128xf32>, vector<32x128xf32> -> vector<32x128xf32>
    %c0_59 = arith.constant 0 : index
    %c0_60 = arith.constant 0 : index
    %248 = vector.load %arg4[%c0_59, %c0_60] : memref<1x128xf32, #tpu.memory_space<vmem>>, vector<1x128xf32>
    %249 = vector.broadcast %248 : vector<1x128xf32> to vector<32x128xf32>
    %250 = arith.addf %247, %249 : vector<32x128xf32>
    %c0_61 = arith.constant 0 : index
    %c0_62 = arith.constant 0 : index
    %251 = vector.load %arg7[%c0_61, %c0_62] : memref<32x128xf32, #tpu.memory_space<vmem>>, vector<32x128xf32>
    tpu.vector_store %arg7[%c0_61, %c0_62], %250 {strides = array<i32>} : memref<32x128xf32, #tpu.memory_space<vmem>>, vector<32x128xf32>,
    return
  }
}

</mosaic_0001>

<bundles_post_ra>
// kernel: char_decoder_forward.1
= control target key start
LH: loop header
LB: loop body
LE: loop exit
PB: predicated region body
PF: predicated region fallthrough
CT: control target
= control target key end

     0   :  { %15 = vsyncpa [#allocation4], 0  ;;  %v1673_v2 = vmov 0   ;;  %v1674_v6 = vmov 0.0|0.0   ;;  %vm1675_vm0 = vmmov 0   ;;  %v1676_v20 = vmov 0.0   ;;  %s2001_s0 = inlined_call_operand.vmem [shape: s32[32,1], index: 0, kind: input, shape index: {}]   ;;  %s2002_s1 = inlined_call_operand.vmem [shape: f32[128,128], index: 1, kind: input, shape index: {}]   ;;  %s2003_s2 = inlined_call_operand.vmem [shape: f32[32,128], index: 2, kind: input, shape index: {}]   ;;  %s2004_s3 = inlined_call_operand.vmem [shape: f32[32,128], index: 3, kind: input, shape index: {}]   ;;  %s2005_s4 = inlined_call_operand.vmem [shape: f32[1,128], index: 4, kind: input, shape index: {}]   ;;  %s2006_s5 = inlined_call_operand.vmem [shape: f32[4,32], index: 5, kind: input, shape index: {}]   ;;  %s2007_s6 = inlined_call_operand.vmem [shape: f32[4,32], index: 6, kind: input, shape index: {}]   ;;  %s2008_s7 = inlined_call_operand.hbm [shape: f32[32,128], index: 7, kind: output, shape index: {0}]   ;;  %s2009_s8 = inlined_call_operand.hbm [shape: f32[4,32], index: 8, kind: output, shape index: {1}]   ;;  %s2010_s9 = inlined_call_operand.hbm [shape: f32[4,32], index: 9, kind: output, shape index: {2}]  }
   0x1   :  { %v31_v0 = vld [vmem:[%s2001_s0] sm:$0xff]  ;;  %1537 = vset.pattern.permute.xlu0 %v1673_v2  ;;  %v62_v3 = vld [vmem:[%s2002_s1 + $0x8] sm:$0xff]  ;;  %v63_v4 = vld [vmem:[%s2002_s1 + $0x10] sm:$0xff]  ;;  %1468 = vmatprep.subr.bf16.mxu1 %v1674_v6 }
   0x2   :  { %v61_v1 = vld [vmem:[%s2002_s1] sm:$0xff]  ;;  %v64_v5 = vld [vmem:[%s2002_s1 + $0x18] sm:$0xff]  ;;  %38 = vperm.xlu0 %1537, %v31_v0   ;;  %1538 = vset.pattern.permute.xlu1 %v1673_v2  ;;  %v32_v9 = vld [vmem:[%s2001_s0 + $0x8] sm:$0xff] }
   0x3   :  { %v1436_v7 = vpack.c.bf16 %v62_v3, %v61_v1  ;;  %v1440_v8 = vpack.c.bf16 %v64_v5, %v63_v4  ;;  %v65_v10 = vld [vmem:[%s2002_s1 + $0x20] sm:$0xff]  ;;  %v66_v11 = vld [vmem:[%s2002_s1 + $0x28] sm:$0xff]  ;;  %v67_v15 = vld [vmem:[%s2002_s1 + $0x30] sm:$0xff]  ;;  %1342 = vmatprep.mubr.msk.f32.mxu1 %vm1675_vm0, %v1676_v20 }
   0x4   :  { %v162_v12 = vld [vmem:[%s2003_s2] sm:$0xff]  ;;  %v163_v13 = vld [vmem:[%s2003_s2 + $0x8] sm:$0xff]  ;;  %v1444_v14 = vpack.c.bf16 %v66_v11, %v65_v10  ;;  %v164_v17 = vld [vmem:[%s2003_s2 + $0x10] sm:$0xff] }
   0x5   :  { %1437 = vmatprep.subr.bf16.mxu0 %v1436_v7  ;;  %v1770_v16 = vpack.c.bf16 %v163_v13, %v162_v12  ;;  %v68_v18 = vld [vmem:[%s2002_s1 + $0x38] sm:$0xff] }
   0x6   :  { %1439 = vmatpush3.bf16.msra.mxu0 %v1436_v7  ;;  %41 = vperm.xlu0 %1537, %v32_v9   ;;  %v165_v19 = vld [vmem:[%s2003_s2 + $0x18] sm:$0xff] }
   0x7   :  { %1441 = vmatprep.subr.bf16.mxu0 %v1440_v8 }
   0x8   :  { %16 = vsyncpa [#allocation6], 0  ;;  %1470 = vmatpush3.bf16.msra.mxu1 %v1770_v16  ;;  %v1784_v21 = vpack.c.bf16 %v165_v19, %v164_v17  ;;  %v1448_v22 = vpack.c.bf16 %v68_v18, %v67_v15  ;;  %v69_v23 = vld [vmem:[%s2002_s1 + $0x40] sm:$0xff]  ;;  %v70_v24 = vld [vmem:[%s2002_s1 + $0x48] sm:$0xff]  ;;  %vm168_vm1 = vcmask 261120   ;;  %v35_v36 = vlaneseq  ;;  %s1679_s13 = smov 32  }
   0x9   :  { %1471 = vmatprep.subr.bf16.mxu1 %v1674_v6  ;;  %v166_v25 = vld [vmem:[%s2006_s5] sm:$0xf]  ;;  %v1452_v26 = vpack.c.bf16 %v70_v24, %v69_v23  ;;  %v71_v27 = vld [vmem:[%s2002_s1 + $0x50] sm:$0xff]  ;;  %v72_v28 = vld [vmem:[%s2002_s1 + $0x58] sm:$0xff]  ;;  %v1677_v39 = vmov 1.0   ;;  %vm275_vm4 = vcmask 257024  }
   0xa   :  { %1443 = vmatpush3.bf16.msra.mxu0 %v1440_v8  ;;  %v1456_v29 = vpack.c.bf16 %v72_v28, %v71_v27  ;;  %v73_v30 = vld [vmem:[%s2002_s1 + $0x60] sm:$0xff]  ;;  %v74_v31 = vld [vmem:[%s2002_s1 + $0x68] sm:$0xff]  ;;  %v75_v33 = vld [vmem:[%s2002_s1 + $0x70] sm:$0xff]  ;;  %v1824_v37 = vand.u32 127, %v35_v36  ;;  %vm384_vm7 = vcmask 261124   ;;  %s1680_s19 = smov 96  }
   0xb   :  { %1445 = vmatprep.subr.bf16.mxu0 %v1444_v14  ;;  %v1460_v32 = vpack.c.bf16 %v74_v31, %v73_v30  ;;  %v76_v34 = vld [vmem:[%s2002_s1 + $0x78] sm:$0xff]  ;;  %s1678_s1 = smov 64   ;;  %v167_v47 = vld [vmem:[%s2007_s6] sm:$0xf] }
   0xc   :  { %1473 = vmatpush3.bf16.msra.mxu1 %v1784_v21  ;;  %v1464_v35 = vpack.c.bf16 %v76_v34, %v75_v33 }
   0xd   :  { %1474 = vmatprep.subr.bf16.mxu1 %v1674_v6 }
   0xe   :  { %1447 = vmatpush3.bf16.msra.mxu0 %v1444_v14 }
   0xf   :  { %1449 = vmatprep.subr.bf16.mxu0 %v1448_v22  ;;  %1343 = vmatmul.mubr.msk.f32.vlgmr.msra.gmra.mrb[0].mxu1 %vm168_vm1, %v166_v25 }
  0x10   :  { %1476 = vmatpush3.bf16.msra.mxu1 %v1770_v16  ;;  %1353 = vmatprep.mubr.msk.f32.mxu1 %vm1675_vm0, %v1676_v20 }
  0x11   :  { %1477 = vmatprep.subr.bf16.mxu1 %v1674_v6 }
  0x12   :  { %1451 = vmatpush3.bf16.msra.mxu0 %v1448_v22 }
  0x13   :  { %1453 = vmatprep.subr.bf16.mxu0 %v1452_v26 }
  0x14   :  { %1479 = vmatpush3.bf16.msra.mxu1 %v1784_v21 }
  0x15   :  { %1480 = vmatprep.subr.bf16.mxu1 %v1674_v6 }
  0x16   :  { %1455 = vmatpush3.bf16.msra.mxu0 %v1452_v26 }
  0x17   :  { %1457 = vmatprep.subr.bf16.mxu0 %v1456_v29 }
  0x1a   :  { %1459 = vmatpush3.bf16.msra.mxu0 %v1456_v29 }
  0x1b   :  { %1461 = vmatprep.subr.bf16.mxu0 %v1460_v32 }
  0x1e   :  { %1463 = vmatpush3.bf16.msra.mxu0 %v1460_v32 }
  0x1f   :  { %1465 = vmatprep.subr.bf16.mxu0 %v1464_v35 }
  0x22   :  { %1467 = vmatpush3.bf16.msra.mxu0 %v1464_v35 }
  0x23   :  { %1504 = vmatprep.subr.bf16.mxu0 %v1674_v6 }
  0x81   :  { %v39_v38 = vpop.permute.xlu0 %38 }
  0x82   :  { %vm49_vm2 = vcmp.eq.s32.totalorder %v1824_v37, %v39_v38 }
  0x83   :  { %1328 = vmatprep.mubr.msk.f32.mxu0 %vm49_vm2, %v1677_v39 }
  0x85   :  { %v42_v40 = vpop.permute.xlu0 %41 }
  0x86   :  { %vm50_vm3 = vcmp.eq.s32.totalorder %v1824_v37, %v42_v40 }
  0x87   :  { %1329 = vmatmul.mubr.msk.f32.vlgmr.msra.gmra.mrb[0].mxu0 %vm50_vm3, %v1677_v39 }
  0x88   :  { %1506 = vmatpush3.bf16.msra.mxu0 %v1770_v16 }
  0x89   :  { %1507 = vmatprep.subr.bf16.mxu0 %v1674_v6 }
  0x8c   :  { %1509 = vmatpush3.bf16.msra.mxu0 %v1784_v21 }
  0xe2   :  { %v238_v41 = vpop.f32.mrb[0].mxu1 }
  0xe3   :  { %v1344_v42 = vpop.f32.mrb[1].mxu1 }
 0x15a   :  { %v1833_v43 = vpop.f32.mrb[0].mxu0 }
 0x15b   :  { %v143_v44 = vpop.f32.mrb[1].mxu0 }
 0x15c   :  { %v242_v45 = vadd.f32 %v238_v41, %v143_v44 }
 0x15e   :  { %1539 = vtanh.f32 %v242_v45  ;;  %v1208_v48 = vmul.f32 -1.442695, %v242_v45 }
 0x160   :  { %1541 = vpow2.f32 %v1208_v48 }
 0x168   :  { %v1540_v46 = vpop.eup %1539 }
 0x169   :  { %256 = vrot.lane.b32.xlu1 %v1540_v46, %s1678_s1 }
 0x16a   :  { %v1542_v49 = vpop.eup %1541 }
 0x16b   :  { %v246_v50 = vadd.f32 1.0, %v1542_v49 }
 0x16d   :  { %251 = vrot.lane.b32.xlu1 %v167_v47, %s1679_s13  ;;  %1543 = vrcp.f32 %v246_v50 }
 0x177   :  { %v1544_v51 = vpop.eup %1543 }
 0x1db   :  { %v257_v52 = vpop.permute.xlu1 %256 }
 0x1dc   :  { %v259_v53 = vmul.f32 %v1544_v51, %v257_v52 }
 0x1de   :  { %261 = vrot.lane.b32.xlu0 %v259_v53, %s1679_s13 }
 0x1df   :  { %v252_v54 = vpop.permute.xlu1 %251 }
 0x1e0   :  { %v254_v55 = vmul.f32 %v1544_v51, %v252_v54  ;;  %v33_v54 = vld [vmem:[%s2001_s0 + $0x10] sm:$0xff] }
 0x250   :  { %v262_v56 = vpop.permute.xlu0 %261 }
 0x251   :  { %v264_v57 = vadd.f32 %v262_v56, %v254_v55 }
 0x253   :  { %1545 = vtanh.f32 %v264_v57  ;;  %v361_v10 = vrot.slane %v264_v57, 4 }
 0x25d   :  { %v1546_v58 = vpop.eup %1545 }
 0x25e   :  { %267 = vrot.lane.b32.xlu1 %v1546_v58, %s1678_s1 }
 0x2d0   :  { %v268_v59 = vpop.permute.xlu1 %267 }
 0x2d1   :  { %v270_v60 = vmul.f32 %v1544_v51, %v268_v59  ;;  %v34_v59 = vld [vmem:[%s2001_s0 + $0x18] sm:$0xff] }
 0x2d3   :  { %272 = vrot.lane.b32.xlu0 %v270_v60, %s1679_s13 }
 0x345   :  { %v273_v61 = vpop.permute.xlu0 %272 }
 0x346   :  { %276 = vst.msk [vmem:[#allocation2] sm:$0xf] %vm275_vm4, %v273_v61  ;;  %1354 = vmatmul.mubr.msk.f32.vlgmr.msra.gmra.mrb[2].mxu1 %vm168_vm1, %v273_v61 }
 0x347   :  { %1482 = vmatpush3.bf16.msra.mxu1 %v1770_v16  ;;  %1364 = vmatprep.mubr.msk.f32.mxu1 %vm1675_vm0, %v1676_v20 }
 0x348   :  { %1483 = vmatprep.subr.bf16.mxu1 %v1674_v6 }
 0x34b   :  { %1485 = vmatpush3.bf16.msra.mxu1 %v1784_v21 }
 0x34c   :  { %1486 = vmatprep.subr.bf16.mxu1 %v1674_v6 }
 0x419   :  { %v345_v62 = vpop.f32.mrb[2].mxu1 }
 0x41a   :  { %v350_v63 = vrot.slane %v345_v62, 4  ;;  %v1355_v0 = vpop.f32.mrb[3].mxu1 }
 0x41c   :  { %v352_v1 = vadd.f32 %v350_v63, %v143_v44 }
 0x41e   :  { %1547 = vtanh.f32 %v352_v1  ;;  %v1210_v3 = vmul.f32 -1.442695, %v352_v1 }
 0x420   :  { %1549 = vpow2.f32 %v1210_v3 }
 0x428   :  { %v1548_v2 = vpop.eup %1547 }
 0x429   :  { %365 = vrot.lane.b32.xlu1 %v1548_v2, %s1678_s1 }
 0x42a   :  { %v1550_v4 = vpop.eup %1549 }
 0x42b   :  { %v356_v5 = vadd.f32 1.0, %v1550_v4 }
 0x42d   :  { %1551 = vrcp.f32 %v356_v5 }
 0x437   :  { %v1552_v7 = vpop.eup %1551 }
 0x438   :  { %v363_v11 = vmul.f32 %v1552_v7, %v361_v10 }
 0x49b   :  { %v366_v8 = vpop.permute.xlu1 %365 }
 0x49c   :  { %v368_v9 = vmul.f32 %v1552_v7, %v366_v8 }
 0x49e   :  { %370 = vrot.lane.b32.xlu0 %v368_v9, %s1679_s13 }
 0x510   :  { %v371_v12 = vpop.permute.xlu0 %370 }
 0x511   :  { %v373_v13 = vadd.f32 %v371_v12, %v363_v11 }
 0x513   :  { %1553 = vtanh.f32 %v373_v13  ;;  %v470_v32 = vrot.slane %v373_v13, 4 }
 0x51d   :  { %v1554_v14 = vpop.eup %1553 }
 0x51e   :  { %376 = vrot.lane.b32.xlu1 %v1554_v14, %s1678_s1 }
 0x590   :  { %v377_v15 = vpop.permute.xlu1 %376 }
 0x591   :  { %v1854_v17 = vmul.f32 %v1552_v7, %v377_v15 }
 0x593   :  { %v386_v18 = vrot.slane %v1854_v17, 4 }
 0x595   :  { %387 = vrot.lane.b32.xlu0 %v386_v18, %s1679_s13 }
 0x607   :  { %v388_v19 = vpop.permute.xlu0 %387 }
 0x608   :  { %1365 = vmatmul.mubr.msk.f32.vlgmr.msra.gmra.mrb[4].mxu1 %vm168_vm1, %v388_v19 }
 0x609   :  { %1488 = vmatpush3.bf16.msra.mxu1 %v1770_v16  ;;  %1375 = vmatprep.mubr.msk.f32.mxu1 %vm1675_vm0, %v1676_v20 }
 0x60a   :  { %1489 = vmatprep.subr.bf16.mxu1 %v1674_v6 }
 0x60d   :  { %1491 = vmatpush3.bf16.msra.mxu1 %v1784_v21 }
 0x60e   :  { %1492 = vmatprep.subr.bf16.mxu1 %v1674_v6 }
 0x6db   :  { %v457_v22 = vpop.f32.mrb[4].mxu1 }
 0x6dc   :  { %v461_v23 = vadd.f32 %v1833_v43, %v457_v22  ;;  %v1366_v24 = vpop.f32.mrb[5].mxu1 }
 0x6de   :  { %1555 = vtanh.f32 %v461_v23  ;;  %v1212_v26 = vmul.f32 -1.442695, %v461_v23 }
 0x6e0   :  { %1557 = vpow2.f32 %v1212_v26 }
 0x6e8   :  { %v1556_v25 = vpop.eup %1555 }
 0x6e9   :  { %474 = vrot.lane.b32.xlu1 %v1556_v25, %s1678_s1 }
 0x6ea   :  { %v1558_v27 = vpop.eup %1557 }
 0x6eb   :  { %v465_v28 = vadd.f32 1.0, %v1558_v27 }
 0x6ed   :  { %1559 = vrcp.f32 %v465_v28 }
 0x6f7   :  { %v1560_v29 = vpop.eup %1559 }
 0x6f8   :  { %v472_v33 = vmul.f32 %v1560_v29, %v470_v32 }
 0x75b   :  { %v475_v30 = vpop.permute.xlu1 %474 }
 0x75c   :  { %v477_v31 = vmul.f32 %v1560_v29, %v475_v30 }
 0x75e   :  { %479 = vrot.lane.b32.xlu0 %v477_v31, %s1679_s13 }
 0x7d0   :  { %v480_v34 = vpop.permute.xlu0 %479 }
 0x7d1   :  { %v482_v35 = vadd.f32 %v480_v34, %v472_v33 }
 0x7d3   :  { %1561 = vtanh.f32 %v482_v35 }
 0x7dd   :  { %v1562_v36 = vpop.eup %1561 }
 0x7de   :  { %485 = vrot.lane.b32.xlu1 %v1562_v36, %s1678_s1 }
 0x850   :  { %v486_v38 = vpop.permute.xlu1 %485 }
 0x851   :  { %v488_v40 = vmul.f32 %v1560_v29, %v486_v38 }
 0x853   :  { %490 = vrot.lane.b32.xlu0 %v488_v40, %s1679_s13 }
 0x8c5   :  { %v491_v41 = vpop.permute.xlu0 %490 }
 0x8c6   :  { %493 = vst.msk [vmem:[#allocation2 + $0x8] sm:$0xf] %vm275_vm4, %v491_v41  ;;  %1376 = vmatmul.mubr.msk.f32.vlgmr.msra.gmra.mrb[6].mxu1 %vm168_vm1, %v491_v41 }
 0x8c7   :  { %1494 = vmatpush3.bf16.msra.mxu1 %v1770_v16  ;;  %1386 = vmatprep.mubr.msk.f32.mxu1 %vm1675_vm0, %v1676_v20 }
 0x8c8   :  { %1495 = vmatprep.subr.bf16.mxu1 %v1674_v6 }
 0x8cb   :  { %1497 = vmatpush3.bf16.msra.mxu1 %v1784_v21 }
 0x8cc   :  { %1498 = vmatprep.subr.bf16.mxu1 %v1674_v6 }
 0x999   :  { %v562_v42 = vpop.f32.mrb[6].mxu1 }
 0x99a   :  { %v567_v44 = vrot.slane %v562_v42, 4  ;;  %v1377_v45 = vpop.f32.mrb[7].mxu1 }
 0x99c   :  { %v569_v46 = vadd.f32 %v1833_v43, %v567_v44  ;;  %v578_v43 = vrot.slane %v482_v35, 4 }
 0x99e   :  { %1563 = vtanh.f32 %v569_v46  ;;  %v1214_v48 = vmul.f32 -1.442695, %v569_v46 }
 0x9a0   :  { %1565 = vpow2.f32 %v1214_v48 }
 0x9a8   :  { %v1564_v47 = vpop.eup %1563 }
 0x9a9   :  { %582 = vrot.lane.b32.xlu1 %v1564_v47, %s1678_s1 }
 0x9aa   :  { %v1566_v49 = vpop.eup %1565 }
 0x9ab   :  { %v573_v50 = vadd.f32 1.0, %v1566_v49 }
 0x9ad   :  { %1567 = vrcp.f32 %v573_v50 }
 0x9b7   :  { %v1568_v51 = vpop.eup %1567 }
 0x9b8   :  { %v580_v55 = vmul.f32 %v1568_v51, %v578_v43 }
 0xa1b   :  { %v583_v52 = vpop.permute.xlu1 %582 }
 0xa1c   :  { %v585_v53 = vmul.f32 %v1568_v51, %v583_v52 }
 0xa1e   :  { %587 = vrot.lane.b32.xlu0 %v585_v53, %s1679_s13 }
 0xa22   :  { %44 = vperm.xlu0 %1537, %v33_v54  }
 0xa90   :  { %v588_v56 = vpop.permute.xlu0 %587 }
 0xa91   :  { %v590_v57 = vadd.f32 %v588_v56, %v580_v55 }
 0xa93   :  { %1569 = vtanh.f32 %v590_v57  ;;  %v686_v13 = vrot.slane %v590_v57, 4 }
 0xa9d   :  { %v1570_v58 = vpop.eup %1569 }
 0xa9e   :  { %593 = vrot.lane.b32.xlu1 %v1570_v58, %s1678_s1 }
 0xaa1   :  { %v45_v60 = vpop.permute.xlu0 %44 }
 0xaa2   :  { %vm51_vm5 = vcmp.eq.s32.totalorder %v1824_v37, %v45_v60  ;;  %47 = vperm.xlu1 %1538, %v34_v59  }
 0xaa3   :  { %1331 = vmatprep.mubr.msk.f32.mxu0 %vm51_vm5, %v1677_v39 }
 0xb10   :  { %v594_v61 = vpop.permute.xlu1 %593 }
 0xb11   :  { %v1890_v62 = vmul.f32 %v1568_v51, %v594_v61 }
 0xb13   :  { %v602_v63 = vrot.slane %v1890_v62, 4 }
 0xb15   :  { %603 = vrot.lane.b32.xlu0 %v602_v63, %s1679_s13 }
 0xb21   :  { %v48_v0 = vpop.permute.xlu1 %47 }
 0xb22   :  { %vm52_vm6 = vcmp.eq.s32.totalorder %v1824_v37, %v48_v0 }
 0xb23   :  { %1332 = vmatmul.mubr.msk.f32.gmra.mrb[2].mxu0 %vm52_vm6, %v1677_v39 }
 0xb24   :  { %1408 = vmatprep.mubr.msk.f32.mxu0 %vm1675_vm0, %v1676_v20 }
 0xb87   :  { %v604_v1 = vpop.permute.xlu0 %603 }
 0xb88   :  { %1387 = vmatmul.mubr.msk.f32.vlgmr.msra.gmra.mrb[8].mxu1 %vm168_vm1, %v604_v1 }
 0xb89   :  { %1500 = vmatpush3.bf16.msra.mxu1 %v1770_v16  ;;  %1397 = vmatprep.mubr.msk.f32.mxu1 %vm1675_vm0, %v1676_v20 }
 0xb8a   :  { %1501 = vmatprep.subr.bf16.mxu1 %v1674_v6 }
 0xb8d   :  { %1503 = vmatpush3.bf16.msra.mxu1 %v1784_v21 }
 0xb8e   :  { %1510 = vmatprep.subr.bf16.mxu1 %v1674_v6 }
 0xbf6   :  { %v1905_v37 = vpop.f32.mrb[2].mxu0 }
 0xbf7   :  { %v153_v39 = vpop.f32.mrb[3].mxu0 }
 0xc5b   :  { %v673_v2 = vpop.f32.mrb[8].mxu1 }
 0xc5c   :  { %v677_v3 = vadd.f32 %v673_v2, %v153_v39  ;;  %v1388_v4 = vpop.f32.mrb[9].mxu1 }
 0xc5e   :  { %1571 = vtanh.f32 %v677_v3  ;;  %v1216_v7 = vmul.f32 -1.442695, %v677_v3 }
 0xc60   :  { %1573 = vpow2.f32 %v1216_v7 }
 0xc68   :  { %v1572_v5 = vpop.eup %1571 }
 0xc69   :  { %690 = vrot.lane.b32.xlu1 %v1572_v5, %s1678_s1 }
 0xc6a   :  { %v1574_v8 = vpop.eup %1573 }
 0xc6b   :  { %v681_v9 = vadd.f32 1.0, %v1574_v8 }
 0xc6d   :  { %1575 = vrcp.f32 %v681_v9 }
 0xc77   :  { %v1576_v10 = vpop.eup %1575 }
 0xc78   :  { %v688_v14 = vmul.f32 %v1576_v10, %v686_v13  ;;  %v1045_v13 = vld [vmem:[%s2004_s3 + $0x8] sm:$0xff] }
 0xcdb   :  { %v691_v11 = vpop.permute.xlu1 %690 }
 0xcdc   :  { %v693_v12 = vmul.f32 %v1576_v10, %v691_v11 }
 0xcde   :  { %695 = vrot.lane.b32.xlu0 %v693_v12, %s1679_s13  ;;  %v1044_v12 = vld [vmem:[%s2004_s3] sm:$0xff] }
 0xd50   :  { %v696_v15 = vpop.permute.xlu0 %695 }
 0xd51   :  { %v698_v18 = vadd.f32 %v696_v15, %v688_v14  ;;  %v1516_v14 = vpack.c.bf16 %v1045_v13, %v1044_v12  ;;  %v1046_v15 = vld [vmem:[%s2004_s3 + $0x10] sm:$0xff] }
 0xd53   :  { %1577 = vtanh.f32 %v698_v18  ;;  %1517 = vmatprep.subr.bf16.mxu0 %v1516_v14 }
 0xd5d   :  { %v1578_v19 = vpop.eup %1577 }
 0xd5e   :  { %701 = vrot.lane.b32.xlu1 %v1578_v19, %s1678_s1 }
 0xdd0   :  { %v702_v22 = vpop.permute.xlu1 %701 }
 0xdd1   :  { %v704_v23 = vmul.f32 %v1576_v10, %v702_v22 }
 0xdd3   :  { %706 = vrot.lane.b32.xlu0 %v704_v23, %s1679_s13 }
 0xe45   :  { %v707_v24 = vpop.permute.xlu0 %706 }
 0xe46   :  { %709 = vst.msk [vmem:[#allocation2 + $0x10] sm:$0xf] %vm275_vm4, %v707_v24  ;;  %1398 = vmatmul.mubr.msk.f32.vlgmr.msra.gmra.mrb[10].mxu1 %vm168_vm1, %v707_v24 }
 0xe47   :  { %1512 = vmatpush3.bf16.msra.mxu1 %v1770_v16  ;;  %1419 = vmatprep.mubr.msk.f32.mxu1 %vm1675_vm0, %v1676_v20 }
 0xe48   :  { %1513 = vmatprep.subr.bf16.mxu1 %v1674_v6  ;;  %v794_v6 = vrot.slane %v698_v18, 4  ;;  %v1047_v18 = vld [vmem:[%s2004_s3 + $0x18] sm:$0xff]  ;;  %s1681_s3 = smov [#allocation5]  }
 0xe49   :  { %v1520_v19 = vpack.c.bf16 %v1047_v18, %v1046_v15  ;;  %s1174_s24 = sshll.u32 %s1681_s3, 4  ;;  %s1175_s24 = int_to_ptr.vmem [resolvable:$true] %s1174_s24 }
 0xe4a   :  { %s1603_s5 = scalar_lea.vmem %s1175_s24, 64  ;;  %p1608_p1 = scmp.lt.s32.totalorder %s1175_s24, %s1175_s24 }
 0xe4b   :  { %1515 = vmatpush3.bf16.msra.mxu1 %v1784_v21  ;;  %p1604_p0 = scmp.ne.s32.totalorder %s1175_s24, %s1603_s5  ;;  %p1609_p2 = scmp.lt.s32.totalorder %s1603_s5, %s1603_s5 }
 0xe4d   :  { %p1610_p3 = por %p1609_p2, %p1608_p1 }
 0xe4f   :  { %p1611_p4 = pnand %p1610_p3, %p1604_p0 }
 0xf19   :  { %v778_v25 = vpop.f32.mrb[10].mxu1 }
 0xf1a   :  { %v783_v26 = vrot.slane %v778_v25, 4  ;;  %v1399_v27 = vpop.f32.mrb[11].mxu1 }
 0xf1c   :  { %v785_v28 = vadd.f32 %v783_v26, %v153_v39 }
 0xf1e   :  { %1579 = vtanh.f32 %v785_v28  ;;  %v1218_v30 = vmul.f32 -1.442695, %v785_v28 }
 0xf20   :  { %1581 = vpow2.f32 %v1218_v30 }
 0xf28   :  { %v1580_v29 = vpop.eup %1579 }
 0xf29   :  { %798 = vrot.lane.b32.xlu1 %v1580_v29, %s1678_s1 }
 0xf2a   :  { %v1582_v31 = vpop.eup %1581 }
 0xf2b   :  { %v789_v32 = vadd.f32 1.0, %v1582_v31 }
 0xf2d   :  { %1583 = vrcp.f32 %v789_v32 }
 0xf37   :  { %v1584_v16 = vpop.eup %1583 }
 0xf38   :  { %v796_v21 = vmul.f32 %v1584_v16, %v794_v6 }
 0xf9b   :  { %v799_v33 = vpop.permute.xlu1 %798 }
 0xf9c   :  { %v801_v20 = vmul.f32 %v1584_v16, %v799_v33 }
 0xf9e   :  { %803 = vrot.lane.b32.xlu0 %v801_v20, %s1679_s13 }
0x1010   :  { %v804_v34 = vpop.permute.xlu0 %803 }
0x1011   :  { %v806_v35 = vadd.f32 %v804_v34, %v796_v21 }
0x1013   :  { %1585 = vtanh.f32 %v806_v35  ;;  %v902_v54 = vrot.slane %v806_v35, 4 }
0x101d   :  { %v1586_v36 = vpop.eup %1585 }
0x101e   :  { %809 = vrot.lane.b32.xlu1 %v1586_v36, %s1678_s1 }
0x1090   :  { %v810_v38 = vpop.permute.xlu1 %809 }
0x1091   :  { %v812_v40 = vmul.f32 %v1584_v16, %v810_v38 }
0x1093   :  { %v818_v41 = vrot.slane %v812_v40, 4 }
0x1095   :  { %819 = vrot.lane.b32.xlu0 %v818_v41, %s1679_s13 }
0x1107   :  { %v820_v42 = vpop.permute.xlu0 %819 }
0x1108   :  { %1409 = vmatmul.mubr.msk.f32.vlgmr.msra.gmra.mrb[4].mxu0 %vm168_vm1, %v820_v42 }
0x1109   :  { %1519 = vmatpush3.bf16.msra.mxu0 %v1516_v14 }
0x110a   :  { %1521 = vmatprep.subr.bf16.mxu0 %v1520_v19 }
0x110d   :  { %1523 = vmatpush3.bf16.msra.mxu0 %v1520_v19 }
0x11db   :  { %v889_v44 = vpop.f32.mrb[4].mxu0 }
0x11dc   :  { %v893_v45 = vadd.f32 %v1905_v37, %v889_v44  ;;  %v1410_v46 = vpop.f32.mrb[5].mxu0 }
0x11de   :  { %1587 = vtanh.f32 %v893_v45  ;;  %v1220_v48 = vmul.f32 -1.442695, %v893_v45 }
0x11e0   :  { %1589 = vpow2.f32 %v1220_v48 }
0x11e8   :  { %v1588_v47 = vpop.eup %1587 }
0x11e9   :  { %906 = vrot.lane.b32.xlu1 %v1588_v47, %s1678_s1 }
0x11ea   :  { %v1590_v49 = vpop.eup %1589 }
0x11eb   :  { %v897_v50 = vadd.f32 1.0, %v1590_v49 }
0x11ed   :  { %1591 = vrcp.f32 %v897_v50 }
0x11f7   :  { %v1592_v51 = vpop.eup %1591 }
0x11f8   :  { %v904_v43 = vmul.f32 %v1592_v51, %v902_v54 }
0x125b   :  { %v907_v52 = vpop.permute.xlu1 %906 }
0x125c   :  { %v909_v53 = vmul.f32 %v1592_v51, %v907_v52 }
0x125e   :  { %911 = vrot.lane.b32.xlu0 %v909_v53, %s1679_s13 }
0x12d0   :  { %v912_v55 = vpop.permute.xlu0 %911 }
0x12d1   :  { %v914_v56 = vadd.f32 %v912_v55, %v904_v43 }
0x12d3   :  { %1593 = vtanh.f32 %v914_v56 }
0x12dd   :  { %v1594_v57 = vpop.eup %1593 }
0x12de   :  { %917 = vrot.lane.b32.xlu1 %v1594_v57, %s1678_s1 }
0x1350   :  { %v918_v58 = vpop.permute.xlu1 %917 }
0x1351   :  { %v920_v59 = vmul.f32 %v1592_v51, %v918_v58 }
0x1353   :  { %922 = vrot.lane.b32.xlu0 %v920_v59, %s1679_s13 }
0x13c5   :  { %v923_v60 = vpop.permute.xlu0 %922 }
0x13c6   :  { %925 = vst.msk [vmem:[#allocation2 + $0x18] sm:$0xf] %vm275_vm4, %v923_v60  ;;  %1420 = vmatmul.mubr.msk.f32.vlgmr.msra.gmra.mrb[12].mxu1 %vm168_vm1, %v923_v60 }
0x1499   :  { %v994_v61 = vpop.f32.mrb[12].mxu1 }
0x149a   :  { %v999_v63 = vrot.slane %v994_v61, 4  ;;  %v1421_v0 = vpop.f32.mrb[13].mxu1 }
0x149c   :  { %v1001_v1 = vadd.f32 %v1905_v37, %v999_v63  ;;  %v1010_v37 = vrot.slane %v914_v56, 4 }
0x149e   :  { %1595 = vtanh.f32 %v1001_v1  ;;  %v1222_v2 = vmul.f32 -1.442695, %v1001_v1 }
0x14a0   :  { %1597 = vpow2.f32 %v1222_v2 }
0x14a8   :  { %v1596_v39 = vpop.eup %1595 }
0x14a9   :  { %1014 = vrot.lane.b32.xlu1 %v1596_v39, %s1678_s1 }
0x14aa   :  { %v1598_v3 = vpop.eup %1597 }
0x14ab   :  { %v1005_v4 = vadd.f32 1.0, %v1598_v3 }
0x14ad   :  { %1599 = vrcp.f32 %v1005_v4 }
0x14b7   :  { %v1600_v5 = vpop.eup %1599 }
0x14b8   :  { %v1012_v9 = vmul.f32 %v1600_v5, %v1010_v37 }
0x151b   :  { %v1015_v7 = vpop.permute.xlu1 %1014 }
0x151c   :  { %v1017_v8 = vmul.f32 %v1600_v5, %v1015_v7 }
0x151e   :  { %1019 = vrot.lane.b32.xlu0 %v1017_v8, %s1679_s13 }
0x1522   :  { %381 = vrot.lane.b32.xlu0 %v1854_v17, %s1679_s13 }
0x1526   :  { %814 = vrot.lane.b32.xlu0 %v812_v40, %s1679_s13 }
0x1590   :  { %v1020_v10 = vpop.permute.xlu0 %1019 }
0x1591   :  { %v1022_v11 = vadd.f32 %v1020_v10, %v1012_v9 }
0x1593   :  { %1601 = vtanh.f32 %v1022_v11  ;;  %1036 = vrot.lane.b32.xlu0 %v1022_v11, %s1680_s19 }
0x1594   :  { %v382_v17 = vpop.permute.xlu0 %381 }
0x1595   :  { %385 = vst.msk [vmem:[#allocation2] sm:$0xf0] %vm384_vm7, %v382_v17 }
0x1598   :  { %v815_v22 = vpop.permute.xlu0 %814 }
0x1599   :  { %817 = vst.msk [vmem:[#allocation2 + $0x10] sm:$0xf0] %vm384_vm7, %v815_v22 }
0x159c   :  { %v1040_v23 = vld [vmem:[#allocation2] sm:$0xff] }
0x159d   :  { %v1602_v24 = vpop.eup %1601  ;;  %1430 = vmatprep.mubr.msk.f32.mxu0 %vm168_vm1, %v1040_v23 }
0x159e   :  { %1025 = vrot.lane.b32.xlu1 %v1602_v24, %s1678_s1 }
0x15a0   :  { %v1042_v30 = vld [vmem:[#allocation2 + $0x10] sm:$0xff] }
0x15a2   :  { %598 = vrot.lane.b32.xlu1 %v1890_v62, %s1679_s13 }
0x1605   :  { %v1037_v25 = vpop.permute.xlu0 %1036 }
0x1606   :  { %1039 = vst.msk [vmem:[#allocation7 - $0x4] sm:$0xf0] %vm384_vm7, %v1037_v25 }
0x1610   :  { %v1026_v26 = vpop.permute.xlu1 %1025 }
0x1611   :  { %v1028_v27 = vmul.f32 %v1600_v5, %v1026_v26 }
0x1613   :  { %1030 = vrot.lane.b32.xlu1 %v1028_v27, %s1679_s13 }
0x1614   :  { %v599_v28 = vpop.permute.xlu1 %598 }
0x1615   :  { %601 = vst.msk [vmem:[#allocation2 + $0x8] sm:$0xf0] %vm384_vm7, %v599_v28 }
0x161c   :  { %v1041_v29 = vld [vmem:[#allocation2 + $0x8] sm:$0xff] }
0x161d   :  { %1431 = vmatmul.mubr.msk.f32.vlgmr.msra.gmra.mrb[6].mxu0 %vm168_vm1, %v1041_v29 }
0x161e   :  { %1433 = vmatprep.mubr.msk.f32.mxu0 %vm168_vm1, %v1042_v30 }
0x1685   :  { %v1031_v31 = vpop.permute.xlu1 %1030 }
0x1686   :  { %1033 = vst.msk [vmem:[#allocation2 + $0x18] sm:$0xf0] %vm384_vm7, %v1031_v31  ;;  %1034 = vst.msk [vmem:[#allocation5 - $0x4] sm:$0xf0] %vm384_vm7, %v1031_v31 }
0x168d   :  { %v1043_v62 = vld [vmem:[#allocation2 + $0x18] sm:$0xff] }
0x168e   :  { %1434 = vmatmul.mubr.msk.f32.gmra.mrb[8].mxu0 %vm168_vm1, %v1043_v62 }
0x168f   :  { %1614 = shalt.err (!%p1611_p4)
}
0x1690   :  { %s1615_s27 = scalar_lea.hbm %s2009_s8, 64 }
0x1691   :  { %p1616_p5 = scmp.ne.s32.totalorder %s2009_s8, %s1615_s27  ;;  %p1619_p6 = scmp.lt.u32.totalorder %s1615_s27, %s2009_s8 }
0x1693   :  { %p1621_p7 = pnand %p1619_p6, %p1616_p5 }
0x1695   :  { %1624 = shalt.err (!%p1621_p7)
}
0x1696   :  { %1177 = dma.vmem_to_hbm [thread:$0]  %s1175_s24, 64, %s2009_s8, [#allocation6]  }
0x1697   :  { %s1682_s12 = smov [#allocation7]  }
0x1698   :  { %s1184_s13 = sshll.u32 %s1682_s12, 4  ;;  %s1185_s13 = int_to_ptr.vmem [resolvable:$true] %s1184_s13 }
0x1699   :  { %s1625_s6 = scalar_lea.vmem %s1185_s13, 64  ;;  %p1630_p9 = scmp.lt.s32.totalorder %s1185_s13, %s1185_s13 }
0x169a   :  { %p1626_p8 = scmp.ne.s32.totalorder %s1185_s13, %s1625_s6  ;;  %p1631_p10 = scmp.lt.s32.totalorder %s1625_s6, %s1625_s6 }
0x169c   :  { %p1632_p11 = por %p1631_p10, %p1630_p9 }
0x169e   :  { %p1633_p12 = pnand %p1632_p11, %p1626_p8 }
0x16a0   :  { %1636 = shalt.err (!%p1633_p12)
}
0x16a1   :  { %s1637_s16 = scalar_lea.hbm %s2010_s9, 64 }
0x16a2   :  { %p1638_p13 = scmp.ne.s32.totalorder %s2010_s9, %s1637_s16  ;;  %p1641_p0 = scmp.lt.u32.totalorder %s1637_s16, %s2010_s9 }
0x16a4   :  { %p1643_p1 = pnand %p1641_p0, %p1638_p13 }
0x16a6   :  { %1646 = shalt.err (!%p1643_p1)
}
0x16a7   :  { %1187 = dma.vmem_to_hbm [thread:$0]  %s1185_s13, 64, %s2010_s9, [#allocation6]   ;;  %v1223_v32 = vld [vmem:[%s2005_s4] ss:$0 sm:$0xff] }
0x16a8   :  { %s1683_s22 = smov [#allocation3]  }
0x16a9   :  { %s1161_s23 = sshll.u32 %s1683_s22, 4  ;;  %s1162_s23 = int_to_ptr.vmem [resolvable:$true] %s1161_s23 }
0x16aa   :  { %s1647_s9 = scalar_lea.vmem %s1162_s23, 512  ;;  %p1652_p3 = scmp.lt.s32.totalorder %s1162_s23, %s1162_s23 }
0x16ab   :  { %p1648_p2 = scmp.ne.s32.totalorder %s1162_s23, %s1647_s9  ;;  %p1653_p4 = scmp.lt.s32.totalorder %s1647_s9, %s1647_s9 }
0x16ad   :  { %p1654_p5 = por %p1653_p4, %p1652_p3 }
0x16af   :  { %p1655_p6 = pnand %p1654_p5, %p1648_p2 }
0x16f0   :  { %v1432_v16 = vpop.f32.mrb[6].mxu0 }
0x16f1   :  { %v1139_v33 = vadd.f32 %v1432_v16, %v1223_v32  ;;  %v1133_v20 = vpop.f32.mrb[7].mxu0 }
0x16f2   :  { %v1134_v6 = vadd.f32 %v1223_v32, %v1133_v20 }
0x16f3   :  { %1153 = vst [vmem:[#allocation3 + $0x8] sm:$0xff] %v1139_v33 }
0x16f4   :  { %1152 = vst [vmem:[#allocation3] sm:$0xff] %v1134_v6 }
0x1761   :  { %v1435_v21 = vpop.f32.mrb[8].mxu0 }
0x1762   :  { %v1149_v34 = vadd.f32 %v1435_v21, %v1223_v32  ;;  %v1143_v35 = vpop.f32.mrb[9].mxu0 }
0x1763   :  { %v1144_v36 = vadd.f32 %v1223_v32, %v1143_v35 }
0x1764   :  { %1155 = vst [vmem:[#allocation3 + $0x18] sm:$0xff] %v1149_v34 }
0x1765   :  { %1154 = vst [vmem:[#allocation3 + $0x10] sm:$0xff] %v1144_v36 }
0x1766   :  { %1658 = shalt.err (!%p1655_p6)
}
0x1767   :  { %s1659_s24 = scalar_lea.hbm %s2008_s7, 512 }
0x1768   :  { %p1660_p7 = scmp.ne.s32.totalorder %s2008_s7, %s1659_s24  ;;  %p1663_p8 = scmp.lt.u32.totalorder %s1659_s24, %s2008_s7 }
0x176a   :  { %p1665_p9 = pnand %p1663_p8, %p1660_p7 }
0x176c   :  { %1668 = shalt.err (!%p1665_p9)
}
0x176d   :  { %s1684_s28 = smov 128   ;;  %s1685_s29 = smov 8  }
0x176e   :  { %1167 = dma.vmem_to_hbm [thread:$0]  %s1162_s23, 512, %s2008_s7, [#allocation4], %s1684_s28, %s1684_s28, %s1685_s29  }
0x176f   :  { %1669 = dma.done.wait [#allocation4], 512  }
0x1770   :  { %1670 = vsyncadd [#allocation4], 4294966784 }
0x1771   :  { %1671 = dma.done.wait [#allocation6], 128  }
0x1772   :  { %1672 = vsyncadd [#allocation6], 4294967168 }
0x1773   :  { %1197 = vsyncpa [#allocation4], 1 }
0x1774   :  { %1198 = vsyncpa [#allocation6], 1 }

</bundles_post_ra>
